<compile_context>
chip_gen: v7x
topology: tpu7x:2x2x1
jax: 0.10.0
libtpu: 0.0.40
codegen_flags: <defaults>
</compile_context>

<pallas_src>
import jax
import jax.numpy as jnp
from jax.experimental import pallas as pl
from jax.experimental.pallas import tpu as pltpu

EPS = 1e-5
LANE = 128
VMEM_LIMIT_BYTES = 48 * 1024 * 1024  # fits v5e/v6e (128 MiB) and v7x (64 MiB)


def _round_up(x, m):
    return (x + m - 1) // m * m


def _pad2d(a, rows, cols):
    return jnp.pad(a, ((0, rows - a.shape[0]), (0, cols - a.shape[1])))


def _compiler_params(sem):
    return pltpu.CompilerParams(dimension_semantics=sem,
                                vmem_limit_bytes=VMEM_LIMIT_BYTES)


# ----------------------------- Pallas kernels ------------------------------ #
def _accumulate_stats(y, sum_ref, sq_ref):
    """Accumulate per-channel sum and sum-of-squares across the M-tile grid."""
    @pl.when(pl.program_id(0) == 0)
    def _():
        sum_ref[...] = jnp.zeros_like(sum_ref)
        sq_ref[...] = jnp.zeros_like(sq_ref)

    sum_ref[...] += jnp.sum(y, axis=0, keepdims=True)
    sq_ref[...] += jnp.sum(y * y, axis=0, keepdims=True)


def _matmul_stats_kernel(a_ref, w_ref, y_ref, sum_ref, sq_ref):
    """Y = A @ W (bf16 operands, f32 accumulate) + per-channel batch stats."""
    y = jnp.dot(a_ref[...], w_ref[...], preferred_element_type=jnp.float32)
    y_ref[...] = y
    _accumulate_stats(y, sum_ref, sq_ref)


def _stats_only_kernel(a_ref, w_ref, sum_ref, sq_ref):
    """Batch stats of A @ W without materializing Y (shortcut branch)."""
    y = jnp.dot(a_ref[...], w_ref[...], preferred_element_type=jnp.float32)
    _accumulate_stats(y, sum_ref, sq_ref)


def _scale_shift_relu_kernel(y_ref, scale_ref, shift_ref, out_ref):
    v = y_ref[...] * scale_ref[...] + shift_ref[...]
    out_ref[...] = jnp.maximum(v, 0.0).astype(out_ref.dtype)


def _bn_add_relu_kernel(y_ref, res_ref, scale_ref, shift_ref, out_ref):
    v = y_ref[...] * scale_ref[...] + shift_ref[...] + res_ref[...]
    out_ref[...] = jnp.maximum(v, 0.0)


def _bn_proj_add_relu_kernel(y_ref, xs_ref, ws_ref, s2_ref, b2_ref,
                             ss_ref, bs_ref, out_ref):
    # Shortcut 1x1 conv recomputed here (its stats came from a stats-only pass)
    # so the shortcut activation never hits HBM.
    sc = jnp.dot(xs_ref[...], ws_ref[...], preferred_element_type=jnp.float32)
    v = (y_ref[...] * s2_ref[...] + b2_ref[...]
         + sc * ss_ref[...] + bs_ref[...])
    out_ref[...] = jnp.maximum(v, 0.0)


# --------------------------- pallas_call wrappers --------------------------- #
def _row_spec(tm, cols):
    return pl.BlockSpec((tm, cols), lambda i: (i, 0))


def _const_spec(rows, cols):
    return pl.BlockSpec((rows, cols), lambda i: (0, 0))


def _matmul_stats(a, w, tm):
    mpad, k = a.shape
    cpad = w.shape[1]
    return pl.pallas_call(
        _matmul_stats_kernel,
        out_shape=(jax.ShapeDtypeStruct((mpad, cpad), jnp.float32),
                   jax.ShapeDtypeStruct((1, cpad), jnp.float32),
                   jax.ShapeDtypeStruct((1, cpad), jnp.float32)),
        grid=(mpad // tm,),
        in_specs=[_row_spec(tm, k), _const_spec(k, cpad)],
        out_specs=(_row_spec(tm, cpad),
                   _const_spec(1, cpad), _const_spec(1, cpad)),
        compiler_params=_compiler_params(("arbitrary",)),
    )(a, w)


def _matmul_stats_only(a, w, tm):
    mpad, k = a.shape
    cpad = w.shape[1]
    return pl.pallas_call(
        _stats_only_kernel,
        out_shape=(jax.ShapeDtypeStruct((1, cpad), jnp.float32),
                   jax.ShapeDtypeStruct((1, cpad), jnp.float32)),
        grid=(mpad // tm,),
        in_specs=[_row_spec(tm, k), _const_spec(k, cpad)],
        out_specs=(_const_spec(1, cpad), _const_spec(1, cpad)),
        compiler_params=_compiler_params(("arbitrary",)),
    )(a, w)


def _scale_shift_relu(y, scale, shift, tm):
    mpad, cpad = y.shape
    return pl.pallas_call(
        _scale_shift_relu_kernel,
        out_shape=jax.ShapeDtypeStruct((mpad, cpad), jnp.bfloat16),
        grid=(mpad // tm,),
        in_specs=[_row_spec(tm, cpad),
                  _const_spec(1, cpad), _const_spec(1, cpad)],
        out_specs=_row_spec(tm, cpad),
        compiler_params=_compiler_params(("parallel",)),
    )(y, scale, shift)


def _bn_add_relu(y, res, scale, shift, tm):
    mpad, cpad = y.shape
    return pl.pallas_call(
        _bn_add_relu_kernel,
        out_shape=jax.ShapeDtypeStruct((mpad, cpad), jnp.float32),
        grid=(mpad // tm,),
        in_specs=[_row_spec(tm, cpad), _row_spec(tm, cpad),
                  _const_spec(1, cpad), _const_spec(1, cpad)],
        out_specs=_row_spec(tm, cpad),
        compiler_params=_compiler_params(("parallel",)),
    )(y, res, scale, shift)


def _bn_proj_add_relu(y, xs, ws, s2, b2, ss, bs, tm):
    mpad, cpad = y.shape
    k = xs.shape[1]
    return pl.pallas_call(
        _bn_proj_add_relu_kernel,
        out_shape=jax.ShapeDtypeStruct((mpad, cpad), jnp.float32),
        grid=(mpad // tm,),
        in_specs=[_row_spec(tm, cpad), _row_spec(tm, k), _const_spec(k, cpad),
                  _const_spec(1, cpad), _const_spec(1, cpad),
                  _const_spec(1, cpad), _const_spec(1, cpad)],
        out_specs=_row_spec(tm, cpad),
        compiler_params=_compiler_params(("parallel",)),
    )(y, xs, ws, s2, b2, ss, bs)


# ------------------------------- JAX glue ----------------------------------- #
def _im2col_3x3(x_nhwc, stride):
    """3x3 / pad=1 im2col.  Returns (N*Ho*Wo, 9*C) with tap order (kh, kw, c)."""
    N, H, W, C = x_nhwc.shape
    Ho = (H + 2 - 3) // stride + 1
    Wo = (W + 2 - 3) // stride + 1
    xp = jnp.pad(x_nhwc, ((0, 0), (1, 1), (1, 1), (0, 0)))
    cols = []
    for kh in range(3):
        for kw in range(3):
            cols.append(
                xp[:, kh:kh + (Ho - 1) * stride + 1:stride,
                   kw:kw + (Wo - 1) * stride + 1:stride, :]
            )
    patches = jnp.concatenate(cols, axis=-1)  # (N, Ho, Wo, 9*C)
    return patches.reshape(N * Ho * Wo, 9 * C), (N, Ho, Wo)


def _prep_weight_3x3(w_oihw, cpad):
    cout, cin = w_oihw.shape[0], w_oihw.shape[1]
    w = jnp.transpose(w_oihw, (2, 3, 1, 0)).reshape(9 * cin, cout)
    return _pad2d(w, 9 * cin, cpad).astype(jnp.bfloat16)


def _bn_scale_shift(s, sq, gamma, beta, m_real):
    """Fold batch stats + gamma/beta into a per-channel scale/shift (f32)."""
    mean = s / m_real
    var = jnp.maximum(sq / m_real - mean * mean, 0.0)
    scale = gamma * jax.lax.rsqrt(var + EPS)
    shift = beta - mean * scale
    return scale, shift


def _choose_tm(m, tile_m):
    # ~512 rows keeps double-buffered bf16 tiles inside v7x's 64 MiB VMEM;
    # on v6e/v5e (128 MiB) tile_m can be raised to 1024-2048.
    return min(tile_m, _round_up(m, LANE))


def init_basic_block_params(key, inchannel, outchannel, stride):
    ks = jax.random.split(key, 9)
    p = {
        "w1": 0.1 * jax.random.normal(ks[0], (outchannel, inchannel, 3, 3), jnp.float32),
        "g1": 1.0 + 0.1 * jax.random.normal(ks[1], (1, outchannel), jnp.float32),
        "b1": 0.1 * jax.random.normal(ks[2], (1, outchannel), jnp.float32),
        "w2": 0.1 * jax.random.normal(ks[3], (outchannel, outchannel, 3, 3), jnp.float32),
        "g2": 1.0 + 0.1 * jax.random.normal(ks[4], (1, outchannel), jnp.float32),
        "b2": 0.1 * jax.random.normal(ks[5], (1, outchannel), jnp.float32),
    }
    if stride != 1 or inchannel != outchannel:
        p["ws"] = 0.1 * jax.random.normal(ks[6], (outchannel, inchannel, 1, 1), jnp.float32)
        p["gs"] = 1.0 + 0.1 * jax.random.normal(ks[7], (1, outchannel), jnp.float32)
        p["bs"] = 0.1 * jax.random.normal(ks[8], (1, outchannel), jnp.float32)
    return p


def basic_block_forward(x_nchw, params, stride, tile_m=512):
    x = jnp.transpose(x_nchw, (0, 2, 3, 1)).astype(jnp.float32)  # NHWC
    N, H, W, Cin = x.shape
    Cout = params["w1"].shape[0]
    Cpad = _round_up(Cout, LANE)  # lane-dense output channels

    # -------- conv1 (3x3, stride) -> tiled matmul + batch stats ------------ #
    p1, (n, ho, wo) = _im2col_3x3(x.astype(jnp.bfloat16), stride)
    m = n * ho * wo
    tm = _choose_tm(m, tile_m)
    mpad = _round_up(m, tm)
    p1 = _pad2d(p1, mpad, p1.shape[1])             # zero rows -> stats unaffected
    w1 = _prep_weight_3x3(params["w1"], Cpad)
    g1 = _pad2d(params["g1"], 1, Cpad)
    b1 = _pad2d(params["b1"], 1, Cpad)

    y1_raw, s1, q1 = _matmul_stats(p1, w1, tm)
    scale1, shift1 = _bn_scale_shift(s1, q1, g1, b1, m)
    y1 = _scale_shift_relu(y1_raw, scale1, shift1, tm)          # bf16 (mpad, Cpad)
    y1 = y1[:m, :Cout].reshape(n, ho, wo, Cout)

    # -------- conv2 (3x3, stride 1) -> tiled matmul + batch stats ----------- #
    p2, _ = _im2col_3x3(y1, 1)
    p2 = _pad2d(p2, mpad, p2.shape[1])
    w2 = _prep_weight_3x3(params["w2"], Cpad)
    g2 = _pad2d(params["g2"], 1, Cpad)
    b2 = _pad2d(params["b2"], 1, Cpad)

    y2_raw, s2, q2 = _matmul_stats(p2, w2, tm)
    scale2, shift2 = _bn_scale_shift(s2, q2, g2, b2, m)

    # -------- shortcut fused into the final normalize/add/relu pass --------- #
    if stride != 1 or Cin != Cout:
        xs = x[:, ::stride, ::stride, :].reshape(m, Cin).astype(jnp.bfloat16)
        xs = _pad2d(xs, mpad, Cin)
        ws = jnp.transpose(params["ws"], (2, 3, 1, 0)).reshape(Cin, Cout)
        ws = _pad2d(ws, Cin, Cpad).astype(jnp.bfloat16)
        gs = _pad2d(params["gs"], 1, Cpad)
        bs = _pad2d(params["bs"], 1, Cpad)
        ssum, ssq = _matmul_stats_only(xs, ws, tm)
        scale_s, shift_s = _bn_scale_shift(ssum, ssq, gs, bs, m)
        out = _bn_proj_add_relu(y2_raw, xs, ws, scale2, shift2,
                                scale_s, shift_s, tm)
    else:
        res = _pad2d(x.reshape(m, Cin), mpad, Cpad)              # identity, f32
        out = _bn_add_relu(y2_raw, res, scale2, shift2, tm)

    out = out[:m, :Cout].reshape(n, ho, wo, Cout)
    return jnp.transpose(out, (0, 3, 1, 2))  # back to NCHW


# --------------------------- pure-JAX reference ------------------------------ #
def _ref_conv(x, w, stride, pad):
    # Mirrors the kernel's mixed precision: bf16 operands, f32 accumulation.
    return jax.lax.conv_general_dilated(
        x.astype(jnp.bfloat16), w.astype(jnp.bfloat16),
        (stride, stride), [(pad, pad), (pad, pad)],
        dimension_numbers=("NCHW", "OIHW", "NCHW"),
        preferred_element_type=jnp.float32)


def _ref_bn(x, gamma, beta):
    mean = jnp.mean(x, axis=(0, 2, 3), keepdims=True)
    var = jnp.mean((x - mean) ** 2, axis=(0, 2, 3), keepdims=True)
    g = gamma.reshape(1, -1, 1, 1)
    b = beta.reshape(1, -1, 1, 1)
    return (x - mean) * jax.lax.rsqrt(var + EPS) * g + b


def basic_block_reference(x, params, stride):
    left = jnp.maximum(_ref_bn(_ref_conv(x, params["w1"], stride, 1),
                               params["g1"], params["b1"]), 0.0)
    left = _ref_bn(_ref_conv(left, params["w2"], 1, 1), params["g2"], params["b2"])
    if "ws" in params:
        sc = _ref_bn(_ref_conv(x, params["ws"], stride, 0), params["gs"], params["bs"])
    else:
        sc = x
    return jnp.maximum(left + sc, 0.0)


# ---------------------------------- main ------------------------------------- #
if __name__ == "__main__":
    key = jax.random.PRNGKey(0)
    k_x, k_p, k_x2, k_p2 = jax.random.split(key, 4)

    # Projection-shortcut block (stride=2, channel change).
    batch, cin, cout, spatial, stride = 2, 4, 8, 16, 2
    x = jax.random.normal(k_x, (batch, cin, spatial, spatial), jnp.float32)
    params = init_basic_block_params(k_p, cin, cout, stride)
    out = jax.block_until_ready(basic_block_forward(x, params, stride))
    ref = jax.block_until_ready(basic_block_reference(x, params, stride))
    assert out.shape == ref.shape, (out.shape, ref.shape)
    assert jnp.allclose(out, ref, rtol=1e-2, atol=1e-2), \
        float(jnp.max(jnp.abs(out - ref)))

    # Identity-shortcut block; tile_m=128 forces a multi-step grid so the
    # tiled BN-stat accumulation (pl.when init + resident accumulator) runs.
    cin2 = cout2 = 8
    x2 = jax.random.normal(k_x2, (batch, cin2, spatial, spatial), jnp.float32)
    params2 = init_basic_block_params(k_p2, cin2, cout2, 1)
    out2 = jax.block_until_ready(basic_block_forward(x2, params2, 1, tile_m=128))
    ref2 = jax.block_until_ready(basic_block_reference(x2, params2, 1))
    assert out2.shape == ref2.shape, (out2.shape, ref2.shape)
    assert jnp.allclose(out2, ref2, rtol=1e-2, atol=1e-2), \
        float(jnp.max(jnp.abs(out2 - ref2)))

    print("KERNEL_OK")
</pallas_src>

<mosaic_0001>
module attributes {stable_mosaic.version = 11 : i64} {
  func.func @_matmul_stats_kernel(%arg0: i32, %arg1: memref<128x36xbf16, #tpu.memory_space<vmem>>, %arg2: memref<36x128xbf16, #tpu.memory_space<vmem>>, %arg3: memref<128x128xf32, #tpu.memory_space<vmem>>, %arg4: memref<1x128xf32, #tpu.memory_space<vmem>>, %arg5: memref<1x128xf32, #tpu.memory_space<vmem>>) attributes {dimension_semantics = [#tpu.dimension_semantics<arbitrary>], iteration_bounds = array<i64: 1>, scalar_prefetch = 0 : i64, scratch_operands = 0 : i64, tpu.core_type = #tpu.core_type<tc>, window_params = [{transform_indices = @transform_0, window_bounds = array<i64: 128, 36>}, {pipeline_mode = #tpu.pipeline_mode<synchronous>, transform_indices = @transform_1, window_bounds = array<i64: 36, 128>}, {transform_indices = @transform_2, window_bounds = array<i64: 128, 128>}, {pipeline_mode = #tpu.pipeline_mode<synchronous>, transform_indices = @transform_3, window_bounds = array<i64: 1, 128>}, {pipeline_mode = #tpu.pipeline_mode<synchronous>, transform_indices = @transform_4, window_bounds = array<i64: 1, 128>}]} {
    %c0 = arith.constant 0 : index
    %c0_0 = arith.constant 0 : index
    %0 = vector.load %arg1[%c0, %c0_0] : memref<128x36xbf16, #tpu.memory_space<vmem>>, vector<128x36xbf16>
    %c0_1 = arith.constant 0 : index
    %c0_2 = arith.constant 0 : index
    %1 = vector.load %arg2[%c0_1, %c0_2] : memref<36x128xbf16, #tpu.memory_space<vmem>>, vector<36x128xbf16>
    %cst = arith.constant dense<0.000000e+00> : vector<128x128xf32>
    %2 = tpu.matmul %0, %1, %cst {dimension_numbers = #tpu.dot_dimension_numbers<[1], [0], [0], [1], [0, 0, 1, 1], [], []>} : vector<128x36xbf16>, vector<36x128xbf16>, vector<128x128xf32> -> vector<128x128xf32>
    %c0_3 = arith.constant 0 : index
    %c0_4 = arith.constant 0 : index
    %3 = vector.load %arg3[%c0_3, %c0_4] : memref<128x128xf32, #tpu.memory_space<vmem>>, vector<128x128xf32>
    tpu.vector_store %arg3[%c0_3, %c0_4], %2 {strides = array<i32>} : memref<128x128xf32, #tpu.memory_space<vmem>>, vector<128x128xf32>,
    %c0_i32 = arith.constant 0 : i32
    %4 = arith.cmpi eq, %arg0, %c0_i32 : i32
    %5 = arith.extui %4 : i1 to i32
    %c0_i32_5 = arith.constant 0 : i32
    %6 = arith.cmpi ne, %5, %c0_i32_5 : i32
    scf.if %6 {
      %cst_16 = arith.constant 0.000000e+00 : f32
      %18 = vector.broadcast %cst_16 : f32 to vector<1x128xf32>
      %c0_17 = arith.constant 0 : index
      %c0_18 = arith.constant 0 : index
      %19 = vector.load %arg4[%c0_17, %c0_18] : memref<1x128xf32, #tpu.memory_space<vmem>>, vector<1x128xf32>
      tpu.vector_store %arg4[%c0_17, %c0_18], %18 {strides = array<i32>} : memref<1x128xf32, #tpu.memory_space<vmem>>, vector<1x128xf32>,
      %cst_19 = arith.constant 0.000000e+00 : f32
      %20 = vector.broadcast %cst_19 : f32 to vector<1x128xf32>
      %c0_20 = arith.constant 0 : index
      %c0_21 = arith.constant 0 : index
      %21 = vector.load %arg5[%c0_20, %c0_21] : memref<1x128xf32, #tpu.memory_space<vmem>>, vector<1x128xf32>
      tpu.vector_store %arg5[%c0_20, %c0_21], %20 {strides = array<i32>} : memref<1x128xf32, #tpu.memory_space<vmem>>, vector<1x128xf32>,
    } else {
    }
    %c0_6 = arith.constant 0 : index
    %c0_7 = arith.constant 0 : index
    %7 = vector.load %arg4[%c0_6, %c0_7] : memref<1x128xf32, #tpu.memory_space<vmem>>, vector<1x128xf32>
    %cst_8 = arith.constant dense<0.000000e+00> : vector<128xf32>
    %8 = vector.multi_reduction <add>, %2, %cst_8 [0] : vector<128x128xf32> to vector<128xf32>
    %9 = vector.shape_cast %8 : vector<128xf32> to vector<1x128xf32>
    %10 = arith.addf %7, %9 : vector<1x128xf32>
    %c0_9 = arith.constant 0 : index
    %c0_10 = arith.constant 0 : index
    %11 = vector.load %arg4[%c0_9, %c0_10] : memref<1x128xf32, #tpu.memory_space<vmem>>, vector<1x128xf32>
    tpu.vector_store %arg4[%c0_9, %c0_10], %10 {strides = array<i32>} : memref<1x128xf32, #tpu.memory_space<vmem>>, vector<1x128xf32>,
    %c0_11 = arith.constant 0 : index
    %c0_12 = arith.constant 0 : index
    %12 = vector.load %arg5[%c0_11, %c0_12] : memref<1x128xf32, #tpu.memory_space<vmem>>, vector<1x128xf32>
    %13 = arith.mulf %2, %2 : vector<128x128xf32>
    %cst_13 = arith.constant dense<0.000000e+00> : vector<128xf32>
    %14 = vector.multi_reduction <add>, %13, %cst_13 [0] : vector<128x128xf32> to vector<128xf32>
    %15 = vector.shape_cast %14 : vector<128xf32> to vector<1x128xf32>
    %16 = arith.addf %12, %15 : vector<1x128xf32>
    %c0_14 = arith.constant 0 : index
    %c0_15 = arith.constant 0 : index
    %17 = vector.load %arg5[%c0_14, %c0_15] : memref<1x128xf32, #tpu.memory_space<vmem>>, vector<1x128xf32>
    tpu.vector_store %arg5[%c0_14, %c0_15], %16 {strides = array<i32>} : memref<1x128xf32, #tpu.memory_space<vmem>>, vector<1x128xf32>,
    return
  }
  func.func @transform_0(%arg0: i32) -> (i32, i32) {
    %c0_i32 = arith.constant 0 : i32
    %c0_i32_0 = arith.constant 0 : i32
    return %arg0, %c0_i32 : i32, i32
  }
  func.func @transform_1(%arg0: i32) -> (i32, i32) {
    %c0_i32 = arith.constant 0 : i32
    %c0_i32_0 = arith.constant 0 : i32
    %c0_i32_1 = arith.constant 0 : i32
    return %c0_i32, %c0_i32_0 : i32, i32
  }
  func.func @transform_2(%arg0: i32) -> (i32, i32) {
    %c0_i32 = arith.constant 0 : i32
    %c0_i32_0 = arith.constant 0 : i32
    return %arg0, %c0_i32 : i32, i32
  }
  func.func @transform_3(%arg0: i32) -> (i32, i32) {
    %c0_i32 = arith.constant 0 : i32
    %c0_i32_0 = arith.constant 0 : i32
    %c0_i32_1 = arith.constant 0 : i32
    return %c0_i32, %c0_i32_0 : i32, i32
  }
  func.func @transform_4(%arg0: i32) -> (i32, i32) {
    %c0_i32 = arith.constant 0 : i32
    %c0_i32_0 = arith.constant 0 : i32
    %c0_i32_1 = arith.constant 0 : i32
    return %c0_i32, %c0_i32_0 : i32, i32
  }
}

</mosaic_0001>

<bundles_post_ra>
// kernel: tpu_custom_call.1
= control target key start
LH: loop header
LB: loop body
LE: loop exit
PB: predicated region body
PF: predicated region fallthrough
CT: control target
= control target key end

     0   :  { %10 = vsyncpa [#allocation3], 0  ;;  %vm93_vm0 = vcmask 293888   ;;  %vm118_vm1 = vcmask 1041408   ;;  %s636_s0 = inlined_call_operand.vmem [shape: bf16[128,36], index: 0, kind: input, shape index: {}]   ;;  %s637_s1 = inlined_call_operand.vmem [shape: bf16[36,128], index: 1, kind: input, shape index: {}]   ;;  %s638_s2 = inlined_call_operand.hbm [shape: f32[128,128], index: 2, kind: output, shape index: {0}]   ;;  %s639_s3 = inlined_call_operand.hbm [shape: f32[1,128], index: 3, kind: output, shape index: {1}]   ;;  %s640_s4 = inlined_call_operand.hbm [shape: f32[1,128], index: 4, kind: output, shape index: {2}]  }
   0x1   :  { %v414_v0 = vld [vmem:[%s637_s1] sm:$0xff]   ;;  %v415_v1 = vld [vmem:[%s637_s1 + $0x8] sm:$0xff]   ;;  %v416_v2 = vld [vmem:[%s637_s1 + $0x10] ss:$0 sps:$4 sm:$0x33]  }
   0x2   :  { %378 = vmatprep.subr.bf16.mxu0 %v414_v0  ;;  %v417_v3 = vld [vmem:[%s636_s0] sm:$0xff]   ;;  %400 = vmatprep.subr.bf16.mxu1 %v414_v0  ;;  %v120_v5 = vsel %vm118_vm1, %v416_v2, 0  ;;  %v418_v6 = vld [vmem:[%s636_s0 + $0x8] sm:$0xff]  }
   0x3   :  { %379 = vmatpush3.bf16.msra.mxu0 %v414_v0  ;;  %403 = vmatpush3.bf16.msra.mxu1 %v414_v0  ;;  %v421_v4 = vld [vmem:[%s636_s0 + $0x20] sm:$0xff]   ;;  %v422_v7 = vld [vmem:[%s636_s0 + $0x28] sm:$0xff]  }
   0x4   :  { %380 = vmatprep.subr.bf16.mxu0 %v415_v1  ;;  %384 = vmatprep.mubr.msk.bf16.mxu0 %vm93_vm0, %v417_v3 }
   0x5   :  { %401 = vmatprep.subr.bf16.mxu1 %v415_v1  ;;  %392 = vmatprep.mubr.msk.bf16.mxu1 %vm93_vm0, %v421_v4 }
   0x7   :  { %381 = vmatpush3.bf16.msra.mxu0 %v415_v1  ;;  %404 = vmatpush3.bf16.msra.mxu1 %v415_v1 }
   0x8   :  { %406 = vmatprep.subr.msk.bf16.mxu0 %vm118_vm1, %v416_v2  ;;  %407 = vmatprep.subr.msk.bf16.mxu1 %vm118_vm1, %v416_v2 }
   0x9   :  { %11 = vsyncpa [#allocation5], 0  ;;  %v419_v8 = vld [vmem:[%s636_s0 + $0x10] sm:$0xff]   ;;  %v420_v10 = vld [vmem:[%s636_s0 + $0x18] sm:$0xff]   ;;  %v495_v12 = vmov 0.0  }
   0xa   :  { %v423_v9 = vld [vmem:[%s636_s0 + $0x30] sm:$0xff]   ;;  %v424_v11 = vld [vmem:[%s636_s0 + $0x38] sm:$0xff]   ;;  %239 = vst [vmem:[#allocation4] sm:$0x1] %v495_v12  ;;  %240 = vst [vmem:[#allocation6] sm:$0x1] %v495_v12 }
   0xb   :  { %383 = vmatpush3.bf16.msra.mxu0 %v120_v5  ;;  %405 = vmatpush3.bf16.msra.mxu1 %v120_v5  ;;  %s496_s0 = smov [#allocation2]  }
   0xc   :  { %s310_s10 = sshll.u32 %s496_s0, 4  ;;  %s576_s10 = int_to_ptr.vmem [resolvable:$true] %s310_s10 }
   0xd   :  { %s425_s11 = scalar_lea.vmem %s576_s10, 2048  ;;  %p430_p1 = scmp.lt.s32.totalorder %s576_s10, %s576_s10 }
   0xe   :  { %385 = vmatmul.mubr.msk.bf16.vlgmr.msra.gmra.mrb[0].mxu0 %vm93_vm0, %v418_v6  ;;  %393 = vmatmul.mubr.msk.bf16.vlgmr.msra.gmra.mrb[0].mxu1 %vm93_vm0, %v422_v7  ;;  %p426_p0 = scmp.ne.s32.totalorder %s576_s10, %s425_s11  ;;  %p431_p2 = scmp.lt.s32.totalorder %s425_s11, %s425_s11 }
   0xf   :  { %388 = vmatprep.mubr.msk.bf16.mxu0 %vm93_vm0, %v419_v8  ;;  %396 = vmatprep.mubr.msk.bf16.mxu1 %vm93_vm0, %v423_v9 }
  0x10   :  { %p432_p3 = por %p431_p2, %p430_p1 }
  0x12   :  { %p433_p4 = pnand %p432_p3, %p426_p0 }
  0x16   :  { %389 = vmatmul.mubr.msk.bf16.gmra.mrb[4].mxu0 %vm93_vm0, %v420_v10  ;;  %397 = vmatmul.mubr.msk.bf16.gmra.mrb[4].mxu1 %vm93_vm0, %v424_v11 }
  0xe1   :  { %v386_v13 = vpop.f32.mrb[0].mxu0  ;;  %v567_v14 = vpop.f32.mrb[0].mxu1 }
  0xe2   :  { %221 = vst [vmem:[#allocation2 + $0x10] sm:$0xff] %v386_v13  ;;  %v156_v15 = vpop.f32.mrb[1].mxu0  ;;  %229 = vst [vmem:[#allocation2 + $0x50] sm:$0xff] %v567_v14  ;;  %v570_v16 = vpop.f32.mrb[1].mxu1  ;;  %v268_v24 = vmul.f32 %v386_v13, %v386_v13 }
  0xe3   :  { %219 = vst [vmem:[#allocation2] sm:$0xff] %v156_v15  ;;  %v387_v17 = vpop.f32.mrb[2].mxu0  ;;  %227 = vst [vmem:[#allocation2 + $0x40] sm:$0xff] %v570_v16  ;;  %v573_v18 = vpop.f32.mrb[2].mxu1  ;;  %v266_v21 = vmul.f32 %v156_v15, %v156_v15 }
  0xe4   :  { %222 = vst [vmem:[#allocation2 + $0x18] sm:$0xff] %v387_v17  ;;  %v159_v19 = vpop.f32.mrb[3].mxu0  ;;  %230 = vst [vmem:[#allocation2 + $0x58] sm:$0xff] %v573_v18  ;;  %v191_v20 = vpop.f32.mrb[3].mxu1  ;;  %v269_v27 = vmul.f32 %v387_v17, %v387_v17 }
  0xe5   :  { %220 = vst [vmem:[#allocation2 + $0x8] sm:$0xff] %v159_v19  ;;  %v242_v22 = vadd.f32 %v159_v19, %v156_v15  ;;  %v267_v23 = vmul.f32 %v159_v19, %v159_v19  ;;  %228 = vst [vmem:[#allocation2 + $0x48] sm:$0xff] %v191_v20 }
  0xe7   :  { %v243_v25 = vadd.f32 %v386_v13, %v242_v22  ;;  %v282_v26 = vadd.f32 %v267_v23, %v266_v21 }
  0xe9   :  { %v283_v28 = vadd.f32 %v282_v26, %v268_v24  ;;  %v390_v29 = vpop.f32.mrb[4].mxu0  ;;  %v244_v30 = vadd.f32 %v387_v17, %v243_v25  ;;  %v398_v31 = vpop.f32.mrb[4].mxu1 }
  0xea   :  { %225 = vst [vmem:[#allocation2 + $0x30] sm:$0xff] %v390_v29  ;;  %v172_v32 = vpop.f32.mrb[5].mxu0  ;;  %233 = vst [vmem:[#allocation2 + $0x70] sm:$0xff] %v398_v31  ;;  %v204_v33 = vpop.f32.mrb[5].mxu1 }
  0xeb   :  { %223 = vst [vmem:[#allocation2 + $0x20] sm:$0xff] %v172_v32  ;;  %v245_v34 = vadd.f32 %v244_v30, %v172_v32  ;;  %v270_v35 = vmul.f32 %v172_v32, %v172_v32  ;;  %v284_v36 = vadd.f32 %v283_v28, %v269_v27  ;;  %v391_v37 = vpop.f32.mrb[6].mxu0  ;;  %231 = vst [vmem:[#allocation2 + $0x60] sm:$0xff] %v204_v33  ;;  %v399_v38 = vpop.f32.mrb[6].mxu1 }
  0xec   :  { %226 = vst [vmem:[#allocation2 + $0x38] sm:$0xff] %v391_v37  ;;  %v175_v39 = vpop.f32.mrb[7].mxu0  ;;  %234 = vst [vmem:[#allocation2 + $0x78] sm:$0xff] %v399_v38  ;;  %v207_v40 = vpop.f32.mrb[7].mxu1 }
  0xed   :  { %v285_v41 = vadd.f32 %v284_v36, %v270_v35  ;;  %224 = vst [vmem:[#allocation2 + $0x28] sm:$0xff] %v175_v39  ;;  %v246_v42 = vadd.f32 %v245_v34, %v175_v39  ;;  %v271_v43 = vmul.f32 %v175_v39, %v175_v39  ;;  %232 = vst [vmem:[#allocation2 + $0x68] sm:$0xff] %v207_v40 }
  0xee   :  { %436 = shalt.err (!%p433_p4)
}
  0xef   :  { %s437_s14 = scalar_lea.hbm %s638_s2, 2048 }
  0xf0   :  { %p438_p5 = scmp.ne.s32.totalorder %s638_s2, %s437_s14  ;;  %p441_p6 = scmp.lt.u32.totalorder %s437_s14, %s638_s2 }
  0xf2   :  { %p443_p7 = pnand %p441_p6, %p438_p5 }
  0xf4   :  { %446 = shalt.err (!%p443_p7)
}
  0xf5   :  { %s497_s19 = smov 128   ;;  %s498_s20 = smov 8   ;;  %v272_v44 = vmul.f32 %v390_v29, %v390_v29  ;;  %v247_v45 = vadd.f32 %v390_v29, %v246_v42  ;;  %v286_v46 = vadd.f32 %v285_v41, %v271_v43  ;;  %v273_v47 = vmul.f32 %v391_v37, %v391_v37  ;;  %v265_v23 = vld [vmem:[#allocation6] sm:$0x1] }
  0xf6   :  { %316 = dma.vmem_to_hbm [thread:$0]  %s576_s10, 2048, %s638_s2, [#allocation3], %s497_s19, %s497_s19, %s498_s20   ;;  %v274_v50 = vmul.f32 %v570_v16, %v570_v16  ;;  %v275_v55 = vmul.f32 %v191_v20, %v191_v20  ;;  %v276_v56 = vmul.f32 %v567_v14, %v567_v14  ;;  %v277_v59 = vmul.f32 %v573_v18, %v573_v18 }
  0xf7   :  { %v287_v48 = vadd.f32 %v286_v46, %v272_v44  ;;  %v248_v49 = vadd.f32 %v391_v37, %v247_v45  ;;  %v278_v62 = vmul.f32 %v204_v33, %v204_v33  ;;  %v279_v3 = vmul.f32 %v207_v40, %v207_v40  ;;  %s499_s2 = smov [#allocation4]   ;;  %s500_s24 = smov [#allocation6]  }
  0xf8   :  { %v280_v4 = vmul.f32 %v398_v31, %v398_v31  ;;  %v281_v7 = vmul.f32 %v399_v38, %v399_v38  ;;  %s323_s23 = sshll.u32 %s499_s2, 4  ;;  %s333_s1 = sshll.u32 %s500_s24, 4  ;;  %s324_s23 = int_to_ptr.vmem [resolvable:$true] %s323_s23  ;;  %s604_s1 = int_to_ptr.vmem [resolvable:$true] %s333_s1 }
  0xf9   :  { %v249_v51 = vadd.f32 %v248_v49, %v570_v16  ;;  %v288_v52 = vadd.f32 %v287_v48, %v273_v47  ;;  %s447_s25 = scalar_lea.vmem %s324_s23, 16  ;;  %s451_s26 = scalar_lea.vmem %s324_s23, 32 }
  0xfa   :  { %p448_p8 = scmp.ne.s32.totalorder %s324_s23, %s447_s25  ;;  %p452_p9 = scmp.lt.s32.totalorder %s324_s23, %s324_s23 }
  0xfb   :  { %v289_v53 = vadd.f32 %v288_v52, %v274_v50  ;;  %v250_v54 = vadd.f32 %v249_v51, %v191_v20  ;;  %v241_v20 = vld [vmem:[#allocation4] sm:$0x1]  ;;  %p453_p10 = scmp.lt.s32.totalorder %s451_s26, %s447_s25 }
  0xfd   :  { %v251_v57 = vadd.f32 %v567_v14, %v250_v54  ;;  %v290_v58 = vadd.f32 %v289_v53, %v275_v55  ;;  %p454_p11 = por %p453_p10, %p452_p9 }
  0xff   :  { %v291_v60 = vadd.f32 %v290_v58, %v276_v56  ;;  %v252_v61 = vadd.f32 %v573_v18, %v251_v57  ;;  %p455_p12 = pnand %p454_p11, %p448_p8 }
 0x101   :  { %v253_v63 = vadd.f32 %v252_v61, %v204_v33  ;;  %v292_v0 = vadd.f32 %v291_v60, %v277_v59 }
 0x103   :  { %v293_v1 = vadd.f32 %v292_v0, %v278_v62  ;;  %v254_v2 = vadd.f32 %v253_v63, %v207_v40 }
 0x105   :  { %v255_v5 = vadd.f32 %v398_v31, %v254_v2  ;;  %v294_v6 = vadd.f32 %v293_v1, %v279_v3 }
 0x107   :  { %v256_v8 = vadd.f32 %v399_v38, %v255_v5  ;;  %v295_v9 = vadd.f32 %v294_v6, %v280_v4 }
 0x109   :  { %v257_v10 = vrot.slane %v256_v8, 4  ;;  %v296_v11 = vadd.f32 %v295_v9, %v281_v7 }
 0x10b   :  { %v258_v12 = vadd.f32 %v257_v10, %v256_v8  ;;  %v297_v13 = vrot.slane %v296_v11, 4 }
 0x10d   :  { %v259_v14 = vrot.slane %v258_v12, 2  ;;  %v298_v15 = vadd.f32 %v297_v13, %v296_v11 }
 0x10f   :  { %v260_v16 = vadd.f32 %v259_v14, %v258_v12  ;;  %v299_v17 = vrot.slane %v298_v15, 2 }
 0x111   :  { %v261_v18 = vrot.slane %v260_v16, 1  ;;  %v300_v19 = vadd.f32 %v299_v17, %v298_v15 }
 0x113   :  { %v262_v21 = vadd.f32 %v261_v18, %v260_v16  ;;  %v301_v22 = vrot.slane %v300_v19, 1 }
 0x115   :  { %v263_v24 = vadd.f32 %v262_v21, %v241_v20  ;;  %v302_v25 = vadd.f32 %v301_v22, %v300_v19 }
 0x117   :  { %264 = vst [vmem:[#allocation4] sm:$0x1] %v263_v24  ;;  %v303_v26 = vadd.f32 %v302_v25, %v265_v23 }
 0x118   :  { %458 = shalt.err (!%p455_p12)
}
 0x119   :  { %s459_s29 = scalar_lea.hbm %s639_s3, 16 }
 0x11a   :  { %p460_p13 = scmp.ne.s32.totalorder %s639_s3, %s459_s29  ;;  %p463_p0 = scmp.lt.u32.totalorder %s459_s29, %s639_s3 }
 0x11c   :  { %p465_p1 = pnand %p463_p0, %p460_p13 }
 0x11e   :  { %468 = shalt.err (!%p465_p1)
}
 0x11f   :  { %326 = dma.vmem_to_hbm [thread:$0]  %s324_s23, 16, %s639_s3, [#allocation5]   ;;  %304 = vst [vmem:[#allocation6] sm:$0x1] %v303_v26 }
 0x120   :  { %s469_s0 = scalar_lea.vmem %s604_s1, 16  ;;  %s473_s10 = scalar_lea.vmem %s604_s1, 32 }
 0x121   :  { %p470_p2 = scmp.ne.s32.totalorder %s604_s1, %s469_s0  ;;  %p474_p3 = scmp.lt.s32.totalorder %s604_s1, %s604_s1 }
 0x122   :  { %p475_p4 = scmp.lt.s32.totalorder %s473_s10, %s469_s0 }
 0x124   :  { %p476_p5 = por %p475_p4, %p474_p3 }
 0x126   :  { %p477_p6 = pnand %p476_p5, %p470_p2 }
 0x128   :  { %480 = shalt.err (!%p477_p6)
}
 0x129   :  { %s481_s13 = scalar_lea.hbm %s640_s4, 16 }
 0x12a   :  { %p482_p7 = scmp.ne.s32.totalorder %s640_s4, %s481_s13  ;;  %p485_p8 = scmp.lt.u32.totalorder %s481_s13, %s640_s4 }
 0x12c   :  { %p487_p9 = pnand %p485_p8, %p482_p7 }
 0x12e   :  { %490 = shalt.err (!%p487_p9)
}
 0x12f   :  { %336 = dma.vmem_to_hbm [thread:$0]  %s604_s1, 16, %s640_s4, [#allocation5]  }
 0x130   :  { %491 = dma.done.wait [#allocation3], 2048  }
 0x131   :  { %492 = vsyncadd [#allocation3], 4294965248 }
 0x132   :  { %493 = dma.done.wait [#allocation5], 32  }
 0x133   :  { %494 = vsyncadd [#allocation5], 4294967264 }
 0x134   :  { %346 = vsyncpa [#allocation3], 1 }
 0x135   :  { %347 = vsyncpa [#allocation5], 1 }

</bundles_post_ra>
